<compile_context>
chip_gen: v6e
topology: v6e:2x2x1
jax: 0.10.0
libtpu: 0.0.40
codegen_flags: <defaults>
</compile_context>

<pallas_src>
import functools

import jax
import jax.numpy as jnp
from jax.experimental import pallas as pl
from jax.experimental.pallas import tpu as pltpu


# ---------------------------------------------------------------------------
# Kernel
# ---------------------------------------------------------------------------
def parallel_nn_kernel(x_ref, w1_ref, b1_ref, w2_ref, b2_ref, wo_ref, bo_ref,
                       o_ref, *, use_sigmoid, lane_dense_out):
    x = x_ref[...]                                       # (tb, D) bf16

    # ---- Fused layer 1: one [D, 2H] matmul, bf16 operands / f32 accumulate.
    h = jnp.dot(x, w1_ref[...], preferred_element_type=jnp.float32)
    h = jnp.maximum(h + b1_ref[...], 0.0)                # f32 bias + ReLU (VPU)

    # ---- Layer 2.
    h16 = h.astype(jnp.bfloat16)
    if len(w2_ref.shape) == 3:
        # Split path (large, lane-aligned H): two [tb,H]x[H,H] matmuls on the
        # two halves of the packed activation -- no zero-padded block-diagonal
        # FLOPs and 4x less W2 VMEM.
        H = w2_ref.shape[1]
        y = jnp.concatenate(
            [jnp.dot(h16[:, :H], w2_ref[0], preferred_element_type=jnp.float32),
             jnp.dot(h16[:, H:], w2_ref[1], preferred_element_type=jnp.float32)],
            axis=-1)
    else:
        # Fused block-diagonal path (small H): single [2H, 2H] matmul; the
        # torch.cat(branch1, branch2) of the reference model is implicit.
        y = jnp.dot(h16, w2_ref[...], preferred_element_type=jnp.float32)
    h = jnp.maximum(y + b2_ref[...], 0.0)

    # ---- Output layer.
    if lane_dense_out:
        # OUT == 1: N=1 matmul would waste the MXU; VPU multiply against the
        # f32 [1, 2H] weight row + lane reduction (XLU) + sigmoid (EUP).
        out = jnp.sum(h * wo_ref[...], axis=-1, keepdims=True) + bo_ref[...]
        if use_sigmoid:
            out = jax.nn.sigmoid(out)
        # Lane-dense store: (tb, 1) -> (1, 1, tb) row (unmasked vst).
        o_ref[...] = out.reshape(o_ref.shape)
    else:
        out = jnp.dot(h.astype(jnp.bfloat16), wo_ref[...],
                      preferred_element_type=jnp.float32) + bo_ref[...]
        if use_sigmoid:
            out = jax.nn.sigmoid(out)
        o_ref[...] = out


# ---------------------------------------------------------------------------
# Wrapper
# ---------------------------------------------------------------------------
_VMEM_LIMIT_BYTES = 32 * 1024 * 1024     # explicit scoped limit, safe on all gens
_VMEM_TILE_BUDGET = 20 * 1024 * 1024     # headroom under the limit for tiles


def _round_up(x, m):
    return ((x + m - 1) // m) * m


def _const_index_map(ndim):
    return lambda i: (0,) * ndim


def _pick_tb(B, D, H, out_size, weight_bytes):
    """VMEM-derived batch tile: multiple of 8, >= 2 grid steps for big B."""
    avail = max(_VMEM_TILE_BUDGET - 2 * weight_bytes, 1 << 20)
    # Per-row bytes: double-buffered bf16 x, double-buffered f32 out (assume
    # 128-lane padding), plus the f32 [., 2H] activation temporaries.
    per_row = 2 * D * 2 + 2 * max(out_size, 128) * 4 + 2 * H * 4
    tb = int(avail // max(per_row, 1))
    tb = max(8, min(tb, 2048))
    tb = min(tb, _round_up(B, 8))
    if B > 512:
        # Guarantee >= 2 grid steps so v7x megacore can shard the batch over
        # both TensorCores.
        tb = min(tb, _round_up(pl.cdiv(B, 2), 8))
    return max(8, (tb // 8) * 8)


def parallel_nn_forward(x, params, *, use_sigmoid=True, tb=None):
    """x: [B, D] float32; params: packed weights from init_params."""
    B, D = x.shape
    out_size = params["bo"].shape[-1]
    H = params["hidden_size"]

    weights = (params["w1"], params["b1"], params["w2"], params["b2"],
               params["wo"], params["bo"])
    weight_bytes = sum(int(w.size) * w.dtype.itemsize for w in weights)

    if tb is None:
        tb = _pick_tb(B, D, H, out_size, weight_bytes)
    num_tiles = pl.cdiv(B, tb)

    x16 = x.astype(jnp.bfloat16)             # halve streamed HBM bytes
    x_spec = pl.BlockSpec((tb, D), lambda i: (i, 0))

    lane_dense_out = (out_size == 1)
    if lane_dense_out:
        # Lane-dense output slab: (num_tiles, 1, tb); unpacked below.
        out_shape = jax.ShapeDtypeStruct((num_tiles, 1, tb), jnp.float32)
        out_spec = pl.BlockSpec((1, 1, tb), lambda i: (i, 0, 0))
    else:
        out_shape = jax.ShapeDtypeStruct((B, out_size), jnp.float32)
        out_spec = pl.BlockSpec((tb, out_size), lambda i: (i, 0))

    kernel = functools.partial(parallel_nn_kernel, use_sigmoid=use_sigmoid,
                               lane_dense_out=lane_dense_out)

    def _call(single_buffer_weights):
        w_specs = []
        for w in weights:
            kwargs = {}
            if single_buffer_weights:
                # Weights never change across grid steps -> single-buffer them
                # (halves their VMEM footprint, frees budget for bigger tb).
                kwargs["pipeline_mode"] = pl.Buffered(1)
            w_specs.append(
                pl.BlockSpec(w.shape, _const_index_map(len(w.shape)), **kwargs))
        out = pl.pallas_call(
            kernel,
            out_shape=out_shape,
            grid=(num_tiles,),
            in_specs=[x_spec] + w_specs,
            out_specs=out_spec,
            compiler_params=pltpu.CompilerParams(
                dimension_semantics=("parallel",),   # v7x: shard batch on 2 TCs
                vmem_limit_bytes=_VMEM_LIMIT_BYTES),
        )(x16, *weights)
        return jax.block_until_ready(out)

    try:
        out = _call(single_buffer_weights=True)
    except Exception:
        # Fallback if this jax/libtpu build rejects pipeline_mode=Buffered(1):
        # identical kernel with default (double) buffering on the weights.
        out = _call(single_buffer_weights=False)

    if lane_dense_out:
        out = out.reshape(num_tiles * tb)[:B].reshape(B, 1)
    return out


# ---------------------------------------------------------------------------
# Parameter packing (PyTorch-style init) and plain-JAX reference
# ---------------------------------------------------------------------------
def init_params(key, input_size, hidden_size, output_size):
    """nn.Linear-style init (uniform +/- 1/sqrt(fan_in)), packed into the
    fused layouts the kernel consumes (matmul weights cast to bf16)."""
    def linear(k, fan_in, fan_out):
        kw, kb = jax.random.split(k)
        bound = 1.0 / float(fan_in) ** 0.5
        w = jax.random.uniform(kw, (fan_in, fan_out), jnp.float32, -bound, bound)
        b = jax.random.uniform(kb, (1, fan_out), jnp.float32, -bound, bound)
        return w, b

    keys = jax.random.split(key, 5)
    w11, b11 = linear(keys[0], input_size, hidden_size)    # branch1_fc1
    w12, b12 = linear(keys[1], hidden_size, hidden_size)   # branch1_fc2
    w21, b21 = linear(keys[2], input_size, hidden_size)    # branch2_fc1
    w22, b22 = linear(keys[3], hidden_size, hidden_size)   # branch2_fc2
    wo, bo = linear(keys[4], 2 * hidden_size, output_size)  # output_layer

    H = hidden_size
    # Fused layer 1: [D, 2H] bf16 / [1, 2H] f32.
    w1 = jnp.concatenate([w11, w21], axis=1).astype(jnp.bfloat16)
    b1 = jnp.concatenate([b11, b21], axis=1)

    # Layer 2: block-diagonal only while 2H fits one MXU tile; otherwise stack
    # the two branch weights (requires lane-aligned H so h[:, :H]/[:, H:]
    # slices don't cross a (8,128) tile).
    split_layer2 = (H % 128 == 0) and (2 * H > 256)
    if split_layer2:
        w2 = jnp.stack([w12, w22], axis=0).astype(jnp.bfloat16)     # (2, H, H)
    else:
        w2 = jnp.zeros((2 * H, 2 * H), jnp.float32)
        w2 = w2.at[:H, :H].set(w12).at[H:, H:].set(w22).astype(jnp.bfloat16)
    b2 = jnp.concatenate([b12, b22], axis=1)

    # Output layer: OUT==1 stored as an f32 [1, 2H] row (VPU path, f32 math);
    # else bf16 [2H, OUT] for the MXU path.
    wo_packed = wo.T if output_size == 1 else wo.astype(jnp.bfloat16)

    return {"w1": w1, "b1": b1, "w2": w2, "b2": b2, "wo": wo_packed, "bo": bo,
            "hidden_size": H,
            # f32 unfused copies, used only by the plain-JAX reference.
            "_ref": {"w11": w11, "b11": b11, "w12": w12, "b12": b12,
                     "w21": w21, "b21": b21, "w22": w22, "b22": b22,
                     "wo": wo, "bo": bo}}


def reference_forward(x, params, *, use_sigmoid=True):
    """Plain-JAX f32 reference mirroring the (unfused) PyTorch forward."""
    p = params["_ref"]
    h1 = jnp.maximum(x @ p["w11"] + p["b11"], 0.0)
    h1 = jnp.maximum(h1 @ p["w12"] + p["b12"], 0.0)
    h2 = jnp.maximum(x @ p["w21"] + p["b21"], 0.0)
    h2 = jnp.maximum(h2 @ p["w22"] + p["b22"], 0.0)
    combined = jnp.concatenate([h1, h2], axis=1)
    out = combined @ p["wo"] + p["bo"]
    return jax.nn.sigmoid(out) if use_sigmoid else out


# ---------------------------------------------------------------------------
# Self-test
# ---------------------------------------------------------------------------
if __name__ == "__main__":
    key = jax.random.PRNGKey(0)

    configs = [
        # tiny: block-diagonal layer-2, VPU output, lane-dense stores, sigmoid
        dict(B=8, D=16, H=32, OUT=1, use_sigmoid=True, atol=2e-2),
        # big H / big B: split layer-2 path, >=2 grid steps (megacore), tb heuristic
        dict(B=1024, D=64, H=256, OUT=1, use_sigmoid=True, atol=2e-2),
        # OUT > 1: MXU output path, logits (BCEWithLogitsLoss regime)
        dict(B=16, D=16, H=32, OUT=4, use_sigmoid=False, atol=5e-2),
    ]

    for cfg in configs:
        key, kx, kp = jax.random.split(key, 3)
        x = jax.random.normal(kx, (cfg["B"], cfg["D"]), jnp.float32)
        params = init_params(kp, cfg["D"], cfg["H"], cfg["OUT"])

        out = parallel_nn_forward(x, params, use_sigmoid=cfg["use_sigmoid"])
        out = jax.block_until_ready(out)

        ref = reference_forward(x, params, use_sigmoid=cfg["use_sigmoid"])
        assert out.shape == (cfg["B"], cfg["OUT"]), (out.shape, cfg)
        err = float(jnp.max(jnp.abs(out - ref)))
        assert err < cfg["atol"], f"max abs err {err} for config {cfg}"

    print("KERNEL_OK")
</pallas_src>

<mosaic_0001>
module attributes {stable_mosaic.version = 11 : i64} {
  func.func @parallel_nn_kernel(%arg0: i32, %arg1: memref<8x16xbf16, #tpu.memory_space<vmem>>, %arg2: memref<16x64xbf16, #tpu.memory_space<vmem>>, %arg3: memref<1x64xf32, #tpu.memory_space<vmem>>, %arg4: memref<64x64xbf16, #tpu.memory_space<vmem>>, %arg5: memref<1x64xf32, #tpu.memory_space<vmem>>, %arg6: memref<1x64xf32, #tpu.memory_space<vmem>>, %arg7: memref<1x1xf32, #tpu.memory_space<vmem>>, %arg8: memref<1x1x8xf32, #tpu.memory_space<vmem>>) attributes {dimension_semantics = [#tpu.dimension_semantics<parallel>], iteration_bounds = array<i64: 1>, scalar_prefetch = 0 : i64, scratch_operands = 0 : i64, tpu.core_type = #tpu.core_type<tc>, window_params = [{transform_indices = @transform_0, window_bounds = array<i64: 8, 16>}, {pipeline_mode = #tpu.pipeline_mode<synchronous>, transform_indices = @transform_1, window_bounds = array<i64: 16, 64>}, {pipeline_mode = #tpu.pipeline_mode<synchronous>, transform_indices = @transform_2, window_bounds = array<i64: 1, 64>}, {pipeline_mode = #tpu.pipeline_mode<synchronous>, transform_indices = @transform_3, window_bounds = array<i64: 64, 64>}, {pipeline_mode = #tpu.pipeline_mode<synchronous>, transform_indices = @transform_4, window_bounds = array<i64: 1, 64>}, {pipeline_mode = #tpu.pipeline_mode<synchronous>, transform_indices = @transform_5, window_bounds = array<i64: 1, 64>}, {pipeline_mode = #tpu.pipeline_mode<synchronous>, transform_indices = @transform_6, window_bounds = array<i64: 1, 1>}, {transform_indices = @transform_7, window_bounds = array<i64: 1, 1, 8>}]} {
    %c0 = arith.constant 0 : index
    %c0_0 = arith.constant 0 : index
    %0 = vector.load %arg1[%c0, %c0_0] : memref<8x16xbf16, #tpu.memory_space<vmem>>, vector<8x16xbf16>
    %c0_1 = arith.constant 0 : index
    %c0_2 = arith.constant 0 : index
    %1 = vector.load %arg2[%c0_1, %c0_2] : memref<16x64xbf16, #tpu.memory_space<vmem>>, vector<16x64xbf16>
    %cst = arith.constant dense<0.000000e+00> : vector<8x64xf32>
    %2 = tpu.matmul %0, %1, %cst {dimension_numbers = #tpu.dot_dimension_numbers<[1], [0], [0], [1], [0, 0, 1, 1], [], []>} : vector<8x16xbf16>, vector<16x64xbf16>, vector<8x64xf32> -> vector<8x64xf32>
    %c0_3 = arith.constant 0 : index
    %c0_4 = arith.constant 0 : index
    %3 = vector.load %arg3[%c0_3, %c0_4] : memref<1x64xf32, #tpu.memory_space<vmem>>, vector<1x64xf32>
    %4 = vector.broadcast %3 : vector<1x64xf32> to vector<8x64xf32>
    %5 = arith.addf %2, %4 : vector<8x64xf32>
    %cst_5 = arith.constant 0.000000e+00 : f32
    %6 = vector.broadcast %cst_5 : f32 to vector<8x64xf32>
    %7 = arith.maximumf %5, %6 : vector<8x64xf32>
    %8 = arith.truncf %7 : vector<8x64xf32> to vector<8x64xbf16>
    %c0_6 = arith.constant 0 : index
    %c0_7 = arith.constant 0 : index
    %9 = vector.load %arg4[%c0_6, %c0_7] : memref<64x64xbf16, #tpu.memory_space<vmem>>, vector<64x64xbf16>
    %cst_8 = arith.constant dense<0.000000e+00> : vector<8x64xf32>
    %10 = tpu.matmul %8, %9, %cst_8 {dimension_numbers = #tpu.dot_dimension_numbers<[1], [0], [0], [1], [0, 0, 1, 1], [], []>} : vector<8x64xbf16>, vector<64x64xbf16>, vector<8x64xf32> -> vector<8x64xf32>
    %c0_9 = arith.constant 0 : index
    %c0_10 = arith.constant 0 : index
    %11 = vector.load %arg5[%c0_9, %c0_10] : memref<1x64xf32, #tpu.memory_space<vmem>>, vector<1x64xf32>
    %12 = vector.broadcast %11 : vector<1x64xf32> to vector<8x64xf32>
    %13 = arith.addf %10, %12 : vector<8x64xf32>
    %cst_11 = arith.constant 0.000000e+00 : f32
    %14 = vector.broadcast %cst_11 : f32 to vector<8x64xf32>
    %15 = arith.maximumf %13, %14 : vector<8x64xf32>
    %c0_12 = arith.constant 0 : index
    %c0_13 = arith.constant 0 : index
    %16 = vector.load %arg6[%c0_12, %c0_13] : memref<1x64xf32, #tpu.memory_space<vmem>>, vector<1x64xf32>
    %17 = vector.broadcast %16 : vector<1x64xf32> to vector<8x64xf32>
    %18 = arith.mulf %15, %17 : vector<8x64xf32>
    %cst_14 = arith.constant dense<0.000000e+00> : vector<8xf32>
    %19 = vector.multi_reduction <add>, %18, %cst_14 [1] : vector<8x64xf32> to vector<8xf32>
    %20 = vector.shape_cast %19 : vector<8xf32> to vector<8x1xf32>
    %c0_15 = arith.constant 0 : index
    %c0_16 = arith.constant 0 : index
    %21 = vector.load %arg7[%c0_15, %c0_16] : memref<1x1xf32, #tpu.memory_space<vmem>>, vector<1x1xf32>
    %22 = vector.broadcast %21 : vector<1x1xf32> to vector<8x1xf32>
    %23 = arith.addf %20, %22 : vector<8x1xf32>
    %24 = arith.negf %23 : vector<8x1xf32>
    %25 = math.exp %24 : vector<8x1xf32>
    %cst_17 = arith.constant 1.000000e+00 : f32
    %26 = vector.broadcast %cst_17 : f32 to vector<8x1xf32>
    %27 = arith.addf %26, %25 : vector<8x1xf32>
    %28 = arith.divf %26, %27 : vector<8x1xf32>
    %29 = vector.shape_cast %28 : vector<8x1xf32> to vector<1x1x8xf32>
    %c0_18 = arith.constant 0 : index
    %c0_19 = arith.constant 0 : index
    %c0_20 = arith.constant 0 : index
    %30 = vector.load %arg8[%c0_18, %c0_19, %c0_20] : memref<1x1x8xf32, #tpu.memory_space<vmem>>, vector<1x1x8xf32>
    tpu.vector_store %arg8[%c0_18, %c0_19, %c0_20], %29 {strides = array<i32>} : memref<1x1x8xf32, #tpu.memory_space<vmem>>, vector<1x1x8xf32>,
    return
  }
  func.func @transform_0(%arg0: i32) -> (i32, i32) {
    %c0_i32 = arith.constant 0 : i32
    %c0_i32_0 = arith.constant 0 : i32
    return %arg0, %c0_i32 : i32, i32
  }
  func.func @transform_1(%arg0: i32) -> (i32, i32) {
    %c0_i32 = arith.constant 0 : i32
    %c0_i32_0 = arith.constant 0 : i32
    %c0_i32_1 = arith.constant 0 : i32
    return %c0_i32, %c0_i32_0 : i32, i32
  }
  func.func @transform_2(%arg0: i32) -> (i32, i32) {
    %c0_i32 = arith.constant 0 : i32
    %c0_i32_0 = arith.constant 0 : i32
    %c0_i32_1 = arith.constant 0 : i32
    return %c0_i32, %c0_i32_0 : i32, i32
  }
  func.func @transform_3(%arg0: i32) -> (i32, i32) {
    %c0_i32 = arith.constant 0 : i32
    %c0_i32_0 = arith.constant 0 : i32
    %c0_i32_1 = arith.constant 0 : i32
    return %c0_i32, %c0_i32_0 : i32, i32
  }
  func.func @transform_4(%arg0: i32) -> (i32, i32) {
    %c0_i32 = arith.constant 0 : i32
    %c0_i32_0 = arith.constant 0 : i32
    %c0_i32_1 = arith.constant 0 : i32
    return %c0_i32, %c0_i32_0 : i32, i32
  }
  func.func @transform_5(%arg0: i32) -> (i32, i32) {
    %c0_i32 = arith.constant 0 : i32
    %c0_i32_0 = arith.constant 0 : i32
    %c0_i32_1 = arith.constant 0 : i32
    return %c0_i32, %c0_i32_0 : i32, i32
  }
  func.func @transform_6(%arg0: i32) -> (i32, i32) {
    %c0_i32 = arith.constant 0 : i32
    %c0_i32_0 = arith.constant 0 : i32
    %c0_i32_1 = arith.constant 0 : i32
    return %c0_i32, %c0_i32_0 : i32, i32
  }
  func.func @transform_7(%arg0: i32) -> (i32, i32, i32) {
    %c0_i32 = arith.constant 0 : i32
    %c0_i32_0 = arith.constant 0 : i32
    %c0_i32_1 = arith.constant 0 : i32
    return %arg0, %c0_i32, %c0_i32_0 : i32, i32, i32
  }
}

module attributes {stable_mosaic.version = 11 : i64} {
  func.func @parallel_nn_kernel(%arg0: i32, %arg1: memref<8x16xbf16, #tpu.memory_space<vmem>>, %arg2: memref<16x64xbf16, #tpu.memory_space<vmem>>, %arg3: memref<1x64xf32, #tpu.memory_space<vmem>>, %arg4: memref<64x64xbf16, #tpu.memory_space<vmem>>, %arg5: memref<1x64xf32, #tpu.memory_space<vmem>>, %arg6: memref<1x64xf32, #tpu.memory_space<vmem>>, %arg7: memref<1x1xf32, #tpu.memory_space<vmem>>, %arg8: memref<1x1x8xf32, #tpu.memory_space<vmem>>) attributes {dimension_semantics = [#tpu.dimension_semantics<parallel>], iteration_bounds = array<i64: 1>, scalar_prefetch = 0 : i64, scratch_operands = 0 : i64, tpu.core_type = #tpu.core_type<tc>, window_params = [{transform_indices = @transform_0, window_bounds = array<i64: 8, 16>}, {pipeline_mode = #tpu.pipeline_mode<synchronous>, transform_indices = @transform_1, window_bounds = array<i64: 16, 64>}, {pipeline_mode = #tpu.pipeline_mode<synchronous>, transform_indices = @transform_2, window_bounds = array<i64: 1, 64>}, {pipeline_mode = #tpu.pipeline_mode<synchronous>, transform_indices = @transform_3, window_bounds = array<i64: 64, 64>}, {pipeline_mode = #tpu.pipeline_mode<synchronous>, transform_indices = @transform_4, window_bounds = array<i64: 1, 64>}, {pipeline_mode = #tpu.pipeline_mode<synchronous>, transform_indices = @transform_5, window_bounds = array<i64: 1, 64>}, {pipeline_mode = #tpu.pipeline_mode<synchronous>, transform_indices = @transform_6, window_bounds = array<i64: 1, 1>}, {transform_indices = @transform_7, window_bounds = array<i64: 1, 1, 8>}]} {
    %c0 = arith.constant 0 : index
    %c0_0 = arith.constant 0 : index
    %0 = vector.load %arg1[%c0, %c0_0] : memref<8x16xbf16, #tpu.memory_space<vmem>>, vector<8x16xbf16>
    %c0_1 = arith.constant 0 : index
    %c0_2 = arith.constant 0 : index
    %1 = vector.load %arg2[%c0_1, %c0_2] : memref<16x64xbf16, #tpu.memory_space<vmem>>, vector<16x64xbf16>
    %cst = arith.constant dense<0.000000e+00> : vector<8x64xf32>
    %2 = tpu.matmul %0, %1, %cst {dimension_numbers = #tpu.dot_dimension_numbers<[1], [0], [0], [1], [0, 0, 1, 1], [], []>} : vector<8x16xbf16>, vector<16x64xbf16>, vector<8x64xf32> -> vector<8x64xf32>
    %c0_3 = arith.constant 0 : index
    %c0_4 = arith.constant 0 : index
    %3 = vector.load %arg3[%c0_3, %c0_4] : memref<1x64xf32, #tpu.memory_space<vmem>>, vector<1x64xf32>
    %4 = vector.broadcast %3 : vector<1x64xf32> to vector<8x64xf32>
    %5 = arith.addf %2, %4 : vector<8x64xf32>
    %cst_5 = arith.constant 0.000000e+00 : f32
    %6 = vector.broadcast %cst_5 : f32 to vector<8x64xf32>
    %7 = arith.maximumf %5, %6 : vector<8x64xf32>
    %8 = arith.truncf %7 : vector<8x64xf32> to vector<8x64xbf16>
    %c0_6 = arith.constant 0 : index
    %c0_7 = arith.constant 0 : index
    %9 = vector.load %arg4[%c0_6, %c0_7] : memref<64x64xbf16, #tpu.memory_space<vmem>>, vector<64x64xbf16>
    %cst_8 = arith.constant dense<0.000000e+00> : vector<8x64xf32>
    %10 = tpu.matmul %8, %9, %cst_8 {dimension_numbers = #tpu.dot_dimension_numbers<[1], [0], [0], [1], [0, 0, 1, 1], [], []>} : vector<8x64xbf16>, vector<64x64xbf16>, vector<8x64xf32> -> vector<8x64xf32>
    %c0_9 = arith.constant 0 : index
    %c0_10 = arith.constant 0 : index
    %11 = vector.load %arg5[%c0_9, %c0_10] : memref<1x64xf32, #tpu.memory_space<vmem>>, vector<1x64xf32>
    %12 = vector.broadcast %11 : vector<1x64xf32> to vector<8x64xf32>
    %13 = arith.addf %10, %12 : vector<8x64xf32>
    %cst_11 = arith.constant 0.000000e+00 : f32
    %14 = vector.broadcast %cst_11 : f32 to vector<8x64xf32>
    %15 = arith.maximumf %13, %14 : vector<8x64xf32>
    %c0_12 = arith.constant 0 : index
    %c0_13 = arith.constant 0 : index
    %16 = vector.load %arg6[%c0_12, %c0_13] : memref<1x64xf32, #tpu.memory_space<vmem>>, vector<1x64xf32>
    %17 = vector.broadcast %16 : vector<1x64xf32> to vector<8x64xf32>
    %18 = arith.mulf %15, %17 : vector<8x64xf32>
    %cst_14 = arith.constant dense<0.000000e+00> : vector<8xf32>
    %19 = vector.multi_reduction <add>, %18, %cst_14 [1] : vector<8x64xf32> to vector<8xf32>
    %20 = vector.shape_cast %19 : vector<8xf32> to vector<8x1xf32>
    %c0_15 = arith.constant 0 : index
    %c0_16 = arith.constant 0 : index
    %21 = vector.load %arg7[%c0_15, %c0_16] : memref<1x1xf32, #tpu.memory_space<vmem>>, vector<1x1xf32>
    %22 = vector.broadcast %21 : vector<1x1xf32> to vector<8x1xf32>
    %23 = arith.addf %20, %22 : vector<8x1xf32>
    %24 = arith.negf %23 : vector<8x1xf32>
    %25 = math.exp %24 : vector<8x1xf32>
    %cst_17 = arith.constant 1.000000e+00 : f32
    %26 = vector.broadcast %cst_17 : f32 to vector<8x1xf32>
    %27 = arith.addf %26, %25 : vector<8x1xf32>
    %28 = arith.divf %26, %27 : vector<8x1xf32>
    %29 = vector.shape_cast %28 : vector<8x1xf32> to vector<1x1x8xf32>
    %c0_18 = arith.constant 0 : index
    %c0_19 = arith.constant 0 : index
    %c0_20 = arith.constant 0 : index
    %30 = vector.load %arg8[%c0_18, %c0_19, %c0_20] : memref<1x1x8xf32, #tpu.memory_space<vmem>>, vector<1x1x8xf32>
    tpu.vector_store %arg8[%c0_18, %c0_19, %c0_20], %29 {strides = array<i32>} : memref<1x1x8xf32, #tpu.memory_space<vmem>>, vector<1x1x8xf32>,
    return
  }
  func.func @transform_0(%arg0: i32) -> (i32, i32) {
    %c0_i32 = arith.constant 0 : i32
    %c0_i32_0 = arith.constant 0 : i32
    return %arg0, %c0_i32 : i32, i32
  }
  func.func @transform_1(%arg0: i32) -> (i32, i32) {
    %c0_i32 = arith.constant 0 : i32
    %c0_i32_0 = arith.constant 0 : i32
    %c0_i32_1 = arith.constant 0 : i32
    return %c0_i32, %c0_i32_0 : i32, i32
  }
  func.func @transform_2(%arg0: i32) -> (i32, i32) {
    %c0_i32 = arith.constant 0 : i32
    %c0_i32_0 = arith.constant 0 : i32
    %c0_i32_1 = arith.constant 0 : i32
    return %c0_i32, %c0_i32_0 : i32, i32
  }
  func.func @transform_3(%arg0: i32) -> (i32, i32) {
    %c0_i32 = arith.constant 0 : i32
    %c0_i32_0 = arith.constant 0 : i32
    %c0_i32_1 = arith.constant 0 : i32
    return %c0_i32, %c0_i32_0 : i32, i32
  }
  func.func @transform_4(%arg0: i32) -> (i32, i32) {
    %c0_i32 = arith.constant 0 : i32
    %c0_i32_0 = arith.constant 0 : i32
    %c0_i32_1 = arith.constant 0 : i32
    return %c0_i32, %c0_i32_0 : i32, i32
  }
  func.func @transform_5(%arg0: i32) -> (i32, i32) {
    %c0_i32 = arith.constant 0 : i32
    %c0_i32_0 = arith.constant 0 : i32
    %c0_i32_1 = arith.constant 0 : i32
    return %c0_i32, %c0_i32_0 : i32, i32
  }
  func.func @transform_6(%arg0: i32) -> (i32, i32) {
    %c0_i32 = arith.constant 0 : i32
    %c0_i32_0 = arith.constant 0 : i32
    %c0_i32_1 = arith.constant 0 : i32
    return %c0_i32, %c0_i32_0 : i32, i32
  }
  func.func @transform_7(%arg0: i32) -> (i32, i32, i32) {
    %c0_i32 = arith.constant 0 : i32
    %c0_i32_0 = arith.constant 0 : i32
    %c0_i32_1 = arith.constant 0 : i32
    return %arg0, %c0_i32, %c0_i32_0 : i32, i32, i32
  }
}

</mosaic_0001>

<bundles_post_ra>
// kernel: tpu_custom_call.1
= control target key start
LH: loop header
LB: loop body
LE: loop exit
PB: predicated region body
PF: predicated region fallthrough
CT: control target
= control target key end

     0   :  { %s484_s0 = inlined_call_operand.hbm [shape: bf16[8,16], index: 0, kind: input, shape index: {}]   ;;  %s485_s1 = inlined_call_operand.hbm [shape: bf16[16,64], index: 1, kind: input, shape index: {}]   ;;  %s486_s2 = inlined_call_operand.vmem [shape: f32[1,64], index: 2, kind: input, shape index: {}]   ;;  %s487_s3 = inlined_call_operand.hbm [shape: bf16[64,64], index: 3, kind: input, shape index: {}]   ;;  %s488_s4 = inlined_call_operand.vmem [shape: f32[1,64], index: 4, kind: input, shape index: {}]   ;;  %s489_s5 = inlined_call_operand.vmem [shape: f32[1,64], index: 5, kind: input, shape index: {}]   ;;  %s490_s6 = inlined_call_operand.<no memory space> [shape: f32[1,1], index: 6, kind: input, shape index: {}]   ;;  %s491_s7 = inlined_call_operand.hbm [shape: f32[1,1,8], index: 7, kind: output, shape index: {}]  }
   0x1   :  { %v12_v0 = vstv %s490_s6 }
   0x2   :  { %13 = vst [vmem:[#allocation2] sm:$0x1] %v12_v0 }
   0x3   :  { %14 = vsyncpa [#allocation4], 0 }
   0x4   :  { %15 = vsyncpa [#allocation7], 0 }
   0x5   :  { %16 = vsyncpa [#allocation5], 0  ;;  %s411_s26 = smov [#allocation6]  }
   0x6   :  { %s32_s27 = sshll.u32 %s411_s26, 4  ;;  %s33_s27 = int_to_ptr.vmem [resolvable:$true] %s32_s27 }
   0x7   :  { %s333_s28 = scalar_lea.vmem %s33_s27, 128  ;;  %p338_p1 = scmp.lt.s32.totalorder %s33_s27, %s33_s27 }
   0x8   :  { %p334_p0 = scmp.ne.s32.totalorder %s33_s27, %s333_s28  ;;  %p339_p2 = scmp.lt.s32.totalorder %s333_s28, %s333_s28 }
   0xa   :  { %p340_p3 = por %p339_p2, %p338_p1 }
   0xc   :  { %p341_p4 = pnand %p340_p3, %p334_p0 }
   0xe   :  { %344 = shalt.err (!%p341_p4)
}
   0xf   :  { %s412_s29 = smov 64   ;;  %s413_s30 = smov 4  }
  0x10   :  { %38 = dma.hbm_to_vmem [thread:$0]  %s485_s1, 128, %s33_s27, [#allocation7], %s412_s29, %s412_s29, %s413_s30  }
  0x11   :  { %s414_s6 = smov [#allocation3]   ;;  %s415_s11 = smov [#allocation8]  }
  0x12   :  { %s23_s10 = sshll.u32 %s414_s6, 4  ;;  %s46_s12 = sshll.u32 %s415_s11, 4  ;;  %s24_s10 = int_to_ptr.vmem [resolvable:$true] %s23_s10  ;;  %s47_s12 = int_to_ptr.vmem [resolvable:$true] %s46_s12 }
  0x13   :  { %s353_s13 = scalar_lea.vmem %s24_s10, 64  ;;  %p358_p6 = scmp.lt.s32.totalorder %s24_s10, %s24_s10 }
  0x14   :  { %p354_p5 = scmp.ne.s32.totalorder %s24_s10, %s353_s13  ;;  %p359_p7 = scmp.lt.s32.totalorder %s353_s13, %s353_s13 }
  0x16   :  { %p360_p8 = por %p359_p7, %p358_p6 }
  0x18   :  { %p361_p9 = pnand %p360_p8, %p354_p5 }
  0x1a   :  { %364 = shalt.err (!%p361_p9)
}
  0x1b   :  { %26 = dma.hbm_to_vmem [thread:$0]  %s484_s0, 64, %s24_s10, [#allocation4]  }
  0x1c   :  { %s373_s16 = scalar_lea.vmem %s47_s12, 512  ;;  %p378_p11 = scmp.lt.s32.totalorder %s47_s12, %s47_s12 }
  0x1d   :  { %p374_p10 = scmp.ne.s32.totalorder %s47_s12, %s373_s16  ;;  %p379_p12 = scmp.lt.s32.totalorder %s373_s16, %s373_s16 }
  0x1f   :  { %p380_p13 = por %p379_p12, %p378_p11 }
  0x21   :  { %p381_p0 = pnand %p380_p13, %p374_p10 }
  0x23   :  { %384 = shalt.err (!%p381_p0)
}
  0x24   :  { %52 = dma.hbm_to_vmem [thread:$0]  %s487_s3, 512, %s47_s12, [#allocation7], %s412_s29, %s412_s29, %s413_s30  }
  0x25   :  { %405 = dma.done.wait [#allocation4], 64  }
  0x26   :  { %406 = vsyncadd [#allocation4], 4294967232 }
  0x27   :  { %407 = dma.done.wait [#allocation7], 640  }
  0x28   :  { %408 = vsyncadd [#allocation7], 4294966656  ;;  %v416_v1 = vmov 0.0   ;;  %vm417_vm0 = vmmov 0   ;;  %v316_v2 = vld [vmem:[#allocation6] sm:$0xff]   ;;  %vm85_vm1 = vcmask 130048   ;;  %v244_v34 = vlaneseq }
  0x29   :  { %288 = vmatprep.subr.bf16.mxu0 %v416_v1  ;;  %290 = vmatprep.mubr.msk.bf16.mxu0 %vm417_vm0, %v416_v1  ;;  %v69_v3 = vld [vmem:[#allocation3] sm:$0xf]  ;;  %v317_v4 = vld [vmem:[#allocation8 + $0x18] sm:$0xff]   ;;  %v319_v6 = vld [vmem:[#allocation8 + $0x8] sm:$0xff]   ;;  %vm170_vm2 = vcmask 523264   ;;  %v418_v26 = vmov 0  }
  0x2a   :  { %294 = vmatprep.subr.bf16.mxu1 %v416_v1  ;;  %302 = vmatprep.mubr.msk.bf16.mxu1 %vm417_vm0, %v416_v1  ;;  %v318_v5 = vld [vmem:[#allocation8 + $0x10] sm:$0xff]   ;;  %v320_v7 = vld [vmem:[#allocation8] sm:$0xff]   ;;  %v245_v35 = vand.u32 127, %v244_v34  ;;  %v247_v36 = vshrl.u32 %v244_v34, 7  ;;  %vm251_vm3 = vcmask 57344  }
  0x2b   :  { %289 = vmatpush3.bf16.msra.mxu0 %v316_v2  ;;  %295 = vmatpush3.bf16.msra.mxu1 %v317_v4  ;;  %v269_v8 = vld [vmem:[%s486_s2] ss:$0 sm:$0xff]  ;;  %s419_s2 = smov [#allocation9]  }
  0x2c   :  { %296 = vmatprep.subr.bf16.mxu1 %v416_v1  ;;  %v272_v16 = vld [vmem:[%s488_s4] ss:$0 sm:$0xff]  ;;  %315 = vset.pattern.permute.xlu0 %v418_v26  ;;  %v248_v37 = vsub.s32 %v245_v35, %v247_v36  ;;  %s259_s4 = sshll.u32 %s419_s2, 4  ;;  %s260_s4 = int_to_ptr.vmem [resolvable:$true] %s259_s4 }
  0x2d   :  { %v278_v20 = vld [vmem:[%s489_s5] ss:$0 sm:$0xff]  ;;  %s385_s5 = scalar_lea.vmem %s260_s4, 16  ;;  %s389_s22 = scalar_lea.vmem %s260_s4, 32 }
  0x2e   :  { %291 = vmatmul.mubr.msk.bf16.vlgmr.msra.gmra.mxu0 %vm85_vm1, %v69_v3  ;;  %v279_v27 = vld [vmem:[#allocation2] ss:$0 sm:$0xff]  ;;  %p386_p1 = scmp.ne.s32.totalorder %s260_s4, %s385_s5  ;;  %p390_p2 = scmp.lt.s32.totalorder %s260_s4, %s260_s4 }
  0x2f   :  { %297 = vmatpush3.bf16.msra.mxu1 %v318_v5  ;;  %p391_p3 = scmp.lt.s32.totalorder %s389_s22, %s385_s5 }
  0x30   :  { %298 = vmatprep.subr.bf16.mxu1 %v416_v1 }
  0x31   :  { %p392_p4 = por %p391_p3, %p390_p2 }
  0x33   :  { %299 = vmatpush3.bf16.msra.mxu1 %v319_v6  ;;  %p393_p5 = pnand %p392_p4, %p386_p1 }
  0x34   :  { %300 = vmatprep.subr.bf16.mxu1 %v416_v1 }
  0x37   :  { %301 = vmatpush3.bf16.msra.mxu1 %v320_v7 }
  0xee   :  { %v123_v9 = vpop.f32.mrf.mxu0 }
  0xef   :  { %v124_v10 = vadd.f32 %v269_v8, %v123_v9 }
  0xf0   :  { %v292_v11 = vpop.f32.mrf.mxu0 }
  0xf1   :  { %v129_v12 = vmax.f32 %v124_v10, 0.0 }
  0xf2   :  { %v126_v13 = vpop.f32.mrf.mxu0 }
  0xf3   :  { %v130_v14 = vpack.c.bf16 %v129_v12, %v129_v12 }
  0xf4   :  { %v293_v15 = vpop.f32.mrf.mxu0 }
  0xf5   :  { %303 = vmatmul.mubr.msk.bf16.vlgmr.msra.gmra.mxu1 %vm170_vm2, %v130_v14 }
 0x1b5   :  { %v208_v17 = vpop.f32.mrf.mxu1 }
 0x1b6   :  { %v209_v18 = vadd.f32 %v272_v16, %v208_v17 }
 0x1b7   :  { %v304_v19 = vpop.f32.mrf.mxu1 }
 0x1b8   :  { %v214_v21 = vmax.f32 %v209_v18, 0.0 }
 0x1b9   :  { %v211_v22 = vpop.f32.mrf.mxu1 }
 0x1ba   :  { %v222_v23 = vmul.f32 %v278_v20, %v214_v21 }
 0x1bb   :  { %v305_v24 = vpop.f32.mrf.mxu1 }
 0x1bc   :  { %v223_v25 = vsel %vm170_vm2, %v222_v23, 0.0 }
 0x1bd   :  { %224 = vadd.xlane.f32.xlu0 %v223_v25 }
 0x246   :  { %v225_v28 = vpop.xlane.xlu0 %224 }
 0x247   :  { %v233_v29 = vadd.f32 %v279_v27, %v225_v28 }
 0x249   :  { %v280_v30 = vmul.f32 -1.442695, %v233_v29 }
 0x24b   :  { %321 = vpow2.f32 %v280_v30 }
 0x258   :  { %v322_v31 = vpop.eup %321 }
 0x259   :  { %v237_v32 = vadd.f32 1.0, %v322_v31 }
 0x25b   :  { %323 = vrcp.f32 %v237_v32 }
 0x268   :  { %v324_v33 = vpop.eup %323 }
 0x269   :  { %242 = vperm.xlu0 %315, %v324_v33  }
 0x2e4   :  { %v243_v38 = vpop.permute.xlu0 %242 }
 0x2e5   :  { %v249_v39 = vrot.slane %v243_v38, %v248_v37 }
 0x2e7   :  { %252 = vst.msk [vmem:[#allocation9] sm:$0x1] %vm251_vm3, %v249_v39 }
 0x2e8   :  { %396 = shalt.err (!%p393_p5)
}
 0x2e9   :  { %262 = dma.vmem_to_hbm [thread:$0]  %s260_s4, 16, %s491_s7, [#allocation5]  }
 0x2ea   :  { %409 = dma.done.wait [#allocation5], 16  }
 0x2eb   :  { %410 = vsyncadd [#allocation5], 4294967280 }
 0x2ec   :  { %266 = vsyncpa [#allocation4], 1 }
 0x2ed   :  { %267 = vsyncpa [#allocation7], 1 }
 0x2ee   :  { %268 = vsyncpa [#allocation5], 1 }

// kernel: tpu_custom_call.1
= control target key start
LH: loop header
LB: loop body
LE: loop exit
PB: predicated region body
PF: predicated region fallthrough
CT: control target
= control target key end

     0   :  { %s484_s0 = inlined_call_operand.hbm [shape: bf16[8,16], index: 0, kind: input, shape index: {}]   ;;  %s485_s1 = inlined_call_operand.hbm [shape: bf16[16,64], index: 1, kind: input, shape index: {}]   ;;  %s486_s2 = inlined_call_operand.vmem [shape: f32[1,64], index: 2, kind: input, shape index: {}]   ;;  %s487_s3 = inlined_call_operand.hbm [shape: bf16[64,64], index: 3, kind: input, shape index: {}]   ;;  %s488_s4 = inlined_call_operand.vmem [shape: f32[1,64], index: 4, kind: input, shape index: {}]   ;;  %s489_s5 = inlined_call_operand.vmem [shape: f32[1,64], index: 5, kind: input, shape index: {}]   ;;  %s490_s6 = inlined_call_operand.<no memory space> [shape: f32[1,1], index: 6, kind: input, shape index: {}]   ;;  %s491_s7 = inlined_call_operand.hbm [shape: f32[1,1,8], index: 7, kind: output, shape index: {}]  }
   0x1   :  { %v12_v0 = vstv %s490_s6 }
   0x2   :  { %13 = vst [vmem:[#allocation2] sm:$0x1] %v12_v0 }
   0x3   :  { %14 = vsyncpa [#allocation4], 0 }
   0x4   :  { %15 = vsyncpa [#allocation7], 0 }
   0x5   :  { %16 = vsyncpa [#allocation5], 0  ;;  %s411_s26 = smov [#allocation6]  }
   0x6   :  { %s32_s27 = sshll.u32 %s411_s26, 4  ;;  %s33_s27 = int_to_ptr.vmem [resolvable:$true] %s32_s27 }
   0x7   :  { %s333_s28 = scalar_lea.vmem %s33_s27, 128  ;;  %p338_p1 = scmp.lt.s32.totalorder %s33_s27, %s33_s27 }
   0x8   :  { %p334_p0 = scmp.ne.s32.totalorder %s33_s27, %s333_s28  ;;  %p339_p2 = scmp.lt.s32.totalorder %s333_s28, %s333_s28 }
   0xa   :  { %p340_p3 = por %p339_p2, %p338_p1 }
   0xc   :  { %p341_p4 = pnand %p340_p3, %p334_p0 }
   0xe   :  { %344 = shalt.err (!%p341_p4)
}
   0xf   :  { %s412_s29 = smov 64   ;;  %s413_s30 = smov 4  }
  0x10   :  { %38 = dma.hbm_to_vmem [thread:$0]  %s485_s1, 128, %s33_s27, [#allocation7], %s412_s29, %s412_s29, %s413_s30  }
  0x11   :  { %s414_s6 = smov [#allocation3]   ;;  %s415_s11 = smov [#allocation8]  }
  0x12   :  { %s23_s10 = sshll.u32 %s414_s6, 4  ;;  %s46_s12 = sshll.u32 %s415_s11, 4  ;;  %s24_s10 = int_to_ptr.vmem [resolvable:$true] %s23_s10  ;;  %s47_s12 = int_to_ptr.vmem [resolvable:$true] %s46_s12 }
  0x13   :  { %s353_s13 = scalar_lea.vmem %s24_s10, 64  ;;  %p358_p6 = scmp.lt.s32.totalorder %s24_s10, %s24_s10 }
  0x14   :  { %p354_p5 = scmp.ne.s32.totalorder %s24_s10, %s353_s13  ;;  %p359_p7 = scmp.lt.s32.totalorder %s353_s13, %s353_s13 }
  0x16   :  { %p360_p8 = por %p359_p7, %p358_p6 }
  0x18   :  { %p361_p9 = pnand %p360_p8, %p354_p5 }
  0x1a   :  { %364 = shalt.err (!%p361_p9)
}
  0x1b   :  { %26 = dma.hbm_to_vmem [thread:$0]  %s484_s0, 64, %s24_s10, [#allocation4]  }
  0x1c   :  { %s373_s16 = scalar_lea.vmem %s47_s12, 512  ;;  %p378_p11 = scmp.lt.s32.totalorder %s47_s12, %s47_s12 }
  0x1d   :  { %p374_p10 = scmp.ne.s32.totalorder %s47_s12, %s373_s16  ;;  %p379_p12 = scmp.lt.s32.totalorder %s373_s16, %s373_s16 }
  0x1f   :  { %p380_p13 = por %p379_p12, %p378_p11 }
  0x21   :  { %p381_p0 = pnand %p380_p13, %p374_p10 }
  0x23   :  { %384 = shalt.err (!%p381_p0)
}
  0x24   :  { %52 = dma.hbm_to_vmem [thread:$0]  %s487_s3, 512, %s47_s12, [#allocation7], %s412_s29, %s412_s29, %s413_s30  }
  0x25   :  { %405 = dma.done.wait [#allocation4], 64  }
  0x26   :  { %406 = vsyncadd [#allocation4], 4294967232 }
  0x27   :  { %407 = dma.done.wait [#allocation7], 640  }
  0x28   :  { %408 = vsyncadd [#allocation7], 4294966656  ;;  %v416_v1 = vmov 0.0   ;;  %vm417_vm0 = vmmov 0   ;;  %v316_v2 = vld [vmem:[#allocation6] sm:$0xff]   ;;  %vm85_vm1 = vcmask 130048   ;;  %v244_v34 = vlaneseq }
  0x29   :  { %288 = vmatprep.subr.bf16.mxu0 %v416_v1  ;;  %290 = vmatprep.mubr.msk.bf16.mxu0 %vm417_vm0, %v416_v1  ;;  %v69_v3 = vld [vmem:[#allocation3] sm:$0xf]  ;;  %v317_v4 = vld [vmem:[#allocation8 + $0x18] sm:$0xff]   ;;  %v319_v6 = vld [vmem:[#allocation8 + $0x8] sm:$0xff]   ;;  %vm170_vm2 = vcmask 523264   ;;  %v418_v26 = vmov 0  }
  0x2a   :  { %294 = vmatprep.subr.bf16.mxu1 %v416_v1  ;;  %302 = vmatprep.mubr.msk.bf16.mxu1 %vm417_vm0, %v416_v1  ;;  %v318_v5 = vld [vmem:[#allocation8 + $0x10] sm:$0xff]   ;;  %v320_v7 = vld [vmem:[#allocation8] sm:$0xff]   ;;  %v245_v35 = vand.u32 127, %v244_v34  ;;  %v247_v36 = vshrl.u32 %v244_v34, 7  ;;  %vm251_vm3 = vcmask 57344  }
  0x2b   :  { %289 = vmatpush3.bf16.msra.mxu0 %v316_v2  ;;  %295 = vmatpush3.bf16.msra.mxu1 %v317_v4  ;;  %v269_v8 = vld [vmem:[%s486_s2] ss:$0 sm:$0xff]  ;;  %s419_s2 = smov [#allocation9]  }
  0x2c   :  { %296 = vmatprep.subr.bf16.mxu1 %v416_v1  ;;  %v272_v16 = vld [vmem:[%s488_s4] ss:$0 sm:$0xff]  ;;  %315 = vset.pattern.permute.xlu0 %v418_v26  ;;  %v248_v37 = vsub.s32 %v245_v35, %v247_v36  ;;  %s259_s4 = sshll.u32 %s419_s2, 4  ;;  %s260_s4 = int_to_ptr.vmem [resolvable:$true] %s259_s4 }
  0x2d   :  { %v278_v20 = vld [vmem:[%s489_s5] ss:$0 sm:$0xff]  ;;  %s385_s5 = scalar_lea.vmem %s260_s4, 16  ;;  %s389_s22 = scalar_lea.vmem %s260_s4, 32 }
  0x2e   :  { %291 = vmatmul.mubr.msk.bf16.vlgmr.msra.gmra.mxu0 %vm85_vm1, %v69_v3  ;;  %v279_v27 = vld [vmem:[#allocation2] ss:$0 sm:$0xff]  ;;  %p386_p1 = scmp.ne.s32.totalorder %s260_s4, %s385_s5  ;;  %p390_p2 = scmp.lt.s32.totalorder %s260_s4, %s260_s4 }
  0x2f   :  { %297 = vmatpush3.bf16.msra.mxu1 %v318_v5  ;;  %p391_p3 = scmp.lt.s32.totalorder %s389_s22, %s385_s5 }
  0x30   :  { %298 = vmatprep.subr.bf16.mxu1 %v416_v1 }
  0x31   :  { %p392_p4 = por %p391_p3, %p390_p2 }
  0x33   :  { %299 = vmatpush3.bf16.msra.mxu1 %v319_v6  ;;  %p393_p5 = pnand %p392_p4, %p386_p1 }
  0x34   :  { %300 = vmatprep.subr.bf16.mxu1 %v416_v1 }
  0x37   :  { %301 = vmatpush3.bf16.msra.mxu1 %v320_v7 }
  0xee   :  { %v123_v9 = vpop.f32.mrf.mxu0 }
  0xef   :  { %v124_v10 = vadd.f32 %v269_v8, %v123_v9 }
  0xf0   :  { %v292_v11 = vpop.f32.mrf.mxu0 }
  0xf1   :  { %v129_v12 = vmax.f32 %v124_v10, 0.0 }
  0xf2   :  { %v126_v13 = vpop.f32.mrf.mxu0 }
  0xf3   :  { %v130_v14 = vpack.c.bf16 %v129_v12, %v129_v12 }
  0xf4   :  { %v293_v15 = vpop.f32.mrf.mxu0 }
  0xf5   :  { %303 = vmatmul.mubr.msk.bf16.vlgmr.msra.gmra.mxu1 %vm170_vm2, %v130_v14 }
 0x1b5   :  { %v208_v17 = vpop.f32.mrf.mxu1 }
 0x1b6   :  { %v209_v18 = vadd.f32 %v272_v16, %v208_v17 }
 0x1b7   :  { %v304_v19 = vpop.f32.mrf.mxu1 }
 0x1b8   :  { %v214_v21 = vmax.f32 %v209_v18, 0.0 }
 0x1b9   :  { %v211_v22 = vpop.f32.mrf.mxu1 }
 0x1ba   :  { %v222_v23 = vmul.f32 %v278_v20, %v214_v21 }
 0x1bb   :  { %v305_v24 = vpop.f32.mrf.mxu1 }
 0x1bc   :  { %v223_v25 = vsel %vm170_vm2, %v222_v23, 0.0 }
 0x1bd   :  { %224 = vadd.xlane.f32.xlu0 %v223_v25 }
 0x246   :  { %v225_v28 = vpop.xlane.xlu0 %224 }
 0x247   :  { %v233_v29 = vadd.f32 %v279_v27, %v225_v28 }
 0x249   :  { %v280_v30 = vmul.f32 -1.442695, %v233_v29 }
 0x24b   :  { %321 = vpow2.f32 %v280_v30 }
 0x258   :  { %v322_v31 = vpop.eup %321 }
 0x259   :  { %v237_v32 = vadd.f32 1.0, %v322_v31 }
 0x25b   :  { %323 = vrcp.f32 %v237_v32 }
 0x268   :  { %v324_v33 = vpop.eup %323 }
 0x269   :  { %242 = vperm.xlu0 %315, %v324_v33  }
 0x2e4   :  { %v243_v38 = vpop.permute.xlu0 %242 }
 0x2e5   :  { %v249_v39 = vrot.slane %v243_v38, %v248_v37 }
 0x2e7   :  { %252 = vst.msk [vmem:[#allocation9] sm:$0x1] %vm251_vm3, %v249_v39 }
 0x2e8   :  { %396 = shalt.err (!%p393_p5)
}
 0x2e9   :  { %262 = dma.vmem_to_hbm [thread:$0]  %s260_s4, 16, %s491_s7, [#allocation5]  }
 0x2ea   :  { %409 = dma.done.wait [#allocation5], 16  }
 0x2eb   :  { %410 = vsyncadd [#allocation5], 4294967280 }
 0x2ec   :  { %266 = vsyncpa [#allocation4], 1 }
 0x2ed   :  { %267 = vsyncpa [#allocation7], 1 }
 0x2ee   :  { %268 = vsyncpa [#allocation5], 1 }

</bundles_post_ra>
